<compile_context>
chip_gen: v5e
topology: v5e:2x2
jax: 0.10.0
libtpu: 0.0.40
codegen_flags: <defaults>
</compile_context>

<pallas_src>
import jax
import jax.numpy as jnp
from jax.experimental import pallas as pl
from jax.experimental.pallas import tpu as pltpu

LEAKY_SLOPE = 0.2
LN_EPS = 1e-5


def _layernorm(h, gamma, beta):
    mean = jnp.mean(h, axis=-1, keepdims=True)
    var = jnp.mean((h - mean) ** 2, axis=-1, keepdims=True)  # biased, like torch
    return (h - mean) * jax.lax.rsqrt(var + LN_EPS) * gamma + beta


def _leaky_relu(h):
    return jnp.where(h > 0, h, LEAKY_SLOPE * h)


def generate_mix_kernel(x_ref,
                        w_in_ref, b_in_ref,
                        w0_ref, b0_ref,
                        w1_ref, b1_ref,
                        w2_ref, b2_ref,
                        w_out_ref, b_out_ref,
                        gamma_ref, beta_ref,
                        out_ref):
    gamma = gamma_ref[...]
    beta = beta_ref[...]

    def block(h_lo, w_ref, b_ref):
        # bf16 x bf16 -> f32 accumulate on the MXU; LN + activation in f32.
        h = jnp.dot(h_lo, w_ref[...], preferred_element_type=jnp.float32) + b_ref[...]
        h = _leaky_relu(_layernorm(h, gamma, beta))
        return h.astype(jnp.bfloat16)

    # input block: latent_dim -> channels, then 3 core blocks channels -> channels
    h = block(x_ref[...], w_in_ref, b_in_ref)
    h = block(h, w0_ref, b0_ref)
    h = block(h, w1_ref, b1_ref)
    h = block(h, w2_ref, b2_ref)

    # output linear: channels -> mixer_channels
    y = jnp.dot(h, w_out_ref[...], preferred_element_type=jnp.float32) + b_out_ref[...]

    # softmax over the trailing dim of size 1 (the view(-1, enc, 1) is done
    # outside): each softmax group has exactly one element, so the result is
    # 1.0 for finite y and NaN for non-finite y (exactly what torch produces).
    # This removes the EUP exp and the VPU divide of the previous version.
    out_ref[...] = jnp.where(jnp.isfinite(y),
                             jnp.ones_like(y),
                             jnp.full_like(y, jnp.nan))


def init_params(key, latent_dim, channels, mixer_channels):
    ks = jax.random.split(key, 10)
    s = 0.05

    def w(k, fan_in, fan_out):
        return jax.random.normal(k, (fan_in, fan_out), jnp.float32) * s

    return {
        "w_in": w(ks[0], latent_dim, channels),
        "b_in": jax.random.normal(ks[1], (1, channels), jnp.float32) * s,
        "w0": w(ks[2], channels, channels),
        "b0": jax.random.normal(ks[3], (1, channels), jnp.float32) * s,
        "w1": w(ks[4], channels, channels),
        "b1": jax.random.normal(ks[5], (1, channels), jnp.float32) * s,
        "w2": w(ks[6], channels, channels),
        "b2": jax.random.normal(ks[7], (1, channels), jnp.float32) * s,
        "w_out": w(ks[8], channels, mixer_channels),
        "b_out": jax.random.normal(ks[9], (1, mixer_channels), jnp.float32) * s,
        # LayerNorm params (PyTorch default init: weight=1, bias=0), shared.
        "gamma": jnp.ones((1, channels), jnp.float32),
        "beta": jnp.zeros((1, channels), jnp.float32),
    }


def generate_mix(x, params, encoding_channels, *, tm=512):
    """x: (batch, n_events, latent_dim) -> (batch*n_events*mixer/enc, enc, 1)."""
    latent_dim = x.shape[-1]
    channels = params["w_in"].shape[-1]
    mixer = params["w_out"].shape[-1]

    xf = x.reshape(-1, latent_dim)
    n = xf.shape[0]
    assert (n * mixer) % encoding_channels == 0, (
        "view(-1, encoding_channels, 1) requires n*mixer_channels to be a "
        "multiple of encoding_channels")

    # Row tile: large multiple of 8 (sublanes); pad N so every block is full.
    tm = int(min(tm, ((n + 7) // 8) * 8))
    tm = max(8, (tm // 8) * 8)
    n_pad = pl.cdiv(n, tm) * tm

    # bf16 streams for x and weight matrices; biases / LN params stay f32.
    xf = xf.astype(jnp.bfloat16)
    if n_pad != n:
        xf = jnp.pad(xf, ((0, n_pad - n), (0, 0)))

    def bf16(name):
        return params[name].astype(jnp.bfloat16)

    def resident(arr):
        # Whole (small) parameter kept VMEM-resident across every grid step.
        return pl.BlockSpec(arr.shape, lambda i: (0, 0))

    w_in, w0, w1, w2, w_out = (bf16(k) for k in ("w_in", "w0", "w1", "w2", "w_out"))
    args = (xf,
            w_in, params["b_in"],
            w0, params["b0"],
            w1, params["b1"],
            w2, params["b2"],
            w_out, params["b_out"],
            params["gamma"], params["beta"])

    in_specs = [pl.BlockSpec((tm, latent_dim), lambda i: (i, 0))]
    in_specs += [resident(a) for a in args[1:]]

    out = pl.pallas_call(
        generate_mix_kernel,
        out_shape=jax.ShapeDtypeStruct((n_pad, mixer), jnp.float32),
        grid=(n_pad // tm,),
        in_specs=in_specs,
        out_specs=pl.BlockSpec((tm, mixer), lambda i: (i, 0)),
        compiler_params=pltpu.CompilerParams(
            dimension_semantics=("parallel",),   # rows are independent -> megacore
        ),
    )(*args)

    out = out[:n]
    # glue: the torch .view(-1, encoding_channels, 1)
    # TODO(synk): flag to the model owner — softmax over a size-1 dim makes the
    # module's output a constant tensor of ones (the whole network is dead code).
    return out.reshape(-1, encoding_channels, 1)


def generate_mix_ref(x, params, encoding_channels):
    """Plain-JAX f32 reference mirroring the PyTorch forward."""
    h = x.reshape(-1, x.shape[-1]).astype(jnp.float32)

    def block(h, w, b):
        h = h @ w + b
        h = _layernorm(h, params["gamma"], params["beta"])
        return _leaky_relu(h)

    h = block(h, params["w_in"], params["b_in"])
    h = block(h, params["w0"], params["b0"])
    h = block(h, params["w1"], params["b1"])
    h = block(h, params["w2"], params["b2"])
    y = h @ params["w_out"] + params["b_out"]
    y = y.reshape(-1, encoding_channels, 1)
    return jax.nn.softmax(y, axis=-1)


if __name__ == "__main__":
    # small shapes consistent with the module
    batch, n_events = 2, 8
    latent_dim = 16
    channels = 32
    mixer_channels = 2
    encoding_channels = 4   # batch*n_events*mixer = 32, divisible by 4

    key = jax.random.PRNGKey(0)
    kx, kp = jax.random.split(key)
    x = jax.random.normal(kx, (batch, n_events, latent_dim), jnp.float32)
    params = init_params(kp, latent_dim, channels, mixer_channels)

    # tm=8 exercises a multi-step grid even at this tiny N (production: ~512).
    out = generate_mix(x, params, encoding_channels, tm=8)
    out = jax.block_until_ready(out)

    ref = generate_mix_ref(x, params, encoding_channels)
    assert out.shape == ref.shape == (batch * n_events * mixer_channels // encoding_channels,
                                      encoding_channels, 1)
    assert jnp.allclose(out, ref, atol=1e-5), "mismatch vs reference"

    print("KERNEL_OK")
</pallas_src>

<mosaic_0001>
module attributes {stable_mosaic.version = 11 : i64} {
  func.func @generate_mix_kernel(%arg0: i32, %arg1: memref<8x16xbf16, #tpu.memory_space<vmem>>, %arg2: memref<16x32xbf16, #tpu.memory_space<vmem>>, %arg3: memref<1x32xf32, #tpu.memory_space<vmem>>, %arg4: memref<32x32xbf16, #tpu.memory_space<vmem>>, %arg5: memref<1x32xf32, #tpu.memory_space<vmem>>, %arg6: memref<32x32xbf16, #tpu.memory_space<vmem>>, %arg7: memref<1x32xf32, #tpu.memory_space<vmem>>, %arg8: memref<32x32xbf16, #tpu.memory_space<vmem>>, %arg9: memref<1x32xf32, #tpu.memory_space<vmem>>, %arg10: memref<32x2xbf16, #tpu.memory_space<vmem>>, %arg11: memref<1x2xf32, #tpu.memory_space<vmem>>, %arg12: memref<1x32xf32, #tpu.memory_space<vmem>>, %arg13: memref<1x32xf32, #tpu.memory_space<vmem>>, %arg14: memref<8x2xf32, #tpu.memory_space<vmem>>) attributes {dimension_semantics = [#tpu.dimension_semantics<parallel>], iteration_bounds = array<i64: 2>, scalar_prefetch = 0 : i64, scratch_operands = 0 : i64, tpu.core_type = #tpu.core_type<tc>, window_params = [{transform_indices = @transform_0, window_bounds = array<i64: 8, 16>}, {pipeline_mode = #tpu.pipeline_mode<synchronous>, transform_indices = @transform_1, window_bounds = array<i64: 16, 32>}, {pipeline_mode = #tpu.pipeline_mode<synchronous>, transform_indices = @transform_2, window_bounds = array<i64: 1, 32>}, {pipeline_mode = #tpu.pipeline_mode<synchronous>, transform_indices = @transform_3, window_bounds = array<i64: 32, 32>}, {pipeline_mode = #tpu.pipeline_mode<synchronous>, transform_indices = @transform_4, window_bounds = array<i64: 1, 32>}, {pipeline_mode = #tpu.pipeline_mode<synchronous>, transform_indices = @transform_5, window_bounds = array<i64: 32, 32>}, {pipeline_mode = #tpu.pipeline_mode<synchronous>, transform_indices = @transform_6, window_bounds = array<i64: 1, 32>}, {pipeline_mode = #tpu.pipeline_mode<synchronous>, transform_indices = @transform_7, window_bounds = array<i64: 32, 32>}, {pipeline_mode = #tpu.pipeline_mode<synchronous>, transform_indices = @transform_8, window_bounds = array<i64: 1, 32>}, {pipeline_mode = #tpu.pipeline_mode<synchronous>, transform_indices = @transform_9, window_bounds = array<i64: 32, 2>}, {pipeline_mode = #tpu.pipeline_mode<synchronous>, transform_indices = @transform_10, window_bounds = array<i64: 1, 2>}, {pipeline_mode = #tpu.pipeline_mode<synchronous>, transform_indices = @transform_11, window_bounds = array<i64: 1, 32>}, {pipeline_mode = #tpu.pipeline_mode<synchronous>, transform_indices = @transform_12, window_bounds = array<i64: 1, 32>}, {transform_indices = @transform_13, window_bounds = array<i64: 8, 2>}]} {
    %c0 = arith.constant 0 : index
    %c0_0 = arith.constant 0 : index
    %0 = vector.load %arg12[%c0, %c0_0] : memref<1x32xf32, #tpu.memory_space<vmem>>, vector<1x32xf32>
    %c0_1 = arith.constant 0 : index
    %c0_2 = arith.constant 0 : index
    %1 = vector.load %arg13[%c0_1, %c0_2] : memref<1x32xf32, #tpu.memory_space<vmem>>, vector<1x32xf32>
    %c0_3 = arith.constant 0 : index
    %c0_4 = arith.constant 0 : index
    %2 = vector.load %arg1[%c0_3, %c0_4] : memref<8x16xbf16, #tpu.memory_space<vmem>>, vector<8x16xbf16>
    %c0_5 = arith.constant 0 : index
    %c0_6 = arith.constant 0 : index
    %3 = vector.load %arg2[%c0_5, %c0_6] : memref<16x32xbf16, #tpu.memory_space<vmem>>, vector<16x32xbf16>
    %cst = arith.constant dense<0.000000e+00> : vector<8x32xf32>
    %4 = tpu.matmul %2, %3, %cst {dimension_numbers = #tpu.dot_dimension_numbers<[1], [0], [0], [1], [0, 0, 1, 1], [], []>} : vector<8x16xbf16>, vector<16x32xbf16>, vector<8x32xf32> -> vector<8x32xf32>
    %c0_7 = arith.constant 0 : index
    %c0_8 = arith.constant 0 : index
    %5 = vector.load %arg3[%c0_7, %c0_8] : memref<1x32xf32, #tpu.memory_space<vmem>>, vector<1x32xf32>
    %6 = vector.broadcast %5 : vector<1x32xf32> to vector<8x32xf32>
    %7 = arith.addf %4, %6 : vector<8x32xf32>
    %cst_9 = arith.constant dense<0.000000e+00> : vector<8xf32>
    %8 = vector.multi_reduction <add>, %7, %cst_9 [1] : vector<8x32xf32> to vector<8xf32>
    %9 = vector.shape_cast %8 : vector<8xf32> to vector<8x1xf32>
    %cst_10 = arith.constant 3.200000e+01 : f32
    %10 = vector.broadcast %cst_10 : f32 to vector<8x1xf32>
    %11 = arith.divf %9, %10 : vector<8x1xf32>
    %12 = vector.broadcast %11 : vector<8x1xf32> to vector<8x32xf32>
    %13 = arith.subf %7, %12 : vector<8x32xf32>
    %14 = arith.mulf %13, %13 : vector<8x32xf32>
    %cst_11 = arith.constant dense<0.000000e+00> : vector<8xf32>
    %15 = vector.multi_reduction <add>, %14, %cst_11 [1] : vector<8x32xf32> to vector<8xf32>
    %16 = vector.shape_cast %15 : vector<8xf32> to vector<8x1xf32>
    %cst_12 = arith.constant 3.200000e+01 : f32
    %17 = vector.broadcast %cst_12 : f32 to vector<8x1xf32>
    %18 = arith.divf %16, %17 : vector<8x1xf32>
    %19 = vector.broadcast %11 : vector<8x1xf32> to vector<8x32xf32>
    %20 = arith.subf %7, %19 : vector<8x32xf32>
    %cst_13 = arith.constant 9.99999974E-6 : f32
    %21 = vector.broadcast %cst_13 : f32 to vector<8x1xf32>
    %22 = arith.addf %18, %21 : vector<8x1xf32>
    %23 = math.rsqrt %22 : vector<8x1xf32>
    %24 = vector.broadcast %23 : vector<8x1xf32> to vector<8x32xf32>
    %25 = arith.mulf %20, %24 : vector<8x32xf32>
    %26 = vector.broadcast %0 : vector<1x32xf32> to vector<8x32xf32>
    %27 = arith.mulf %25, %26 : vector<8x32xf32>
    %28 = vector.broadcast %1 : vector<1x32xf32> to vector<8x32xf32>
    %29 = arith.addf %27, %28 : vector<8x32xf32>
    %cst_14 = arith.constant 0.000000e+00 : f32
    %30 = vector.broadcast %cst_14 : f32 to vector<8x32xf32>
    %31 = arith.cmpf ogt, %29, %30 : vector<8x32xf32>
    %cst_15 = arith.constant 2.000000e-01 : f32
    %32 = vector.broadcast %cst_15 : f32 to vector<8x32xf32>
    %33 = arith.mulf %32, %29 : vector<8x32xf32>
    %34 = arith.select %31, %29, %33 : vector<8x32xi1>, vector<8x32xf32>
    %35 = arith.truncf %34 : vector<8x32xf32> to vector<8x32xbf16>
    %c0_16 = arith.constant 0 : index
    %c0_17 = arith.constant 0 : index
    %36 = vector.load %arg4[%c0_16, %c0_17] : memref<32x32xbf16, #tpu.memory_space<vmem>>, vector<32x32xbf16>
    %cst_18 = arith.constant dense<0.000000e+00> : vector<8x32xf32>
    %37 = tpu.matmul %35, %36, %cst_18 {dimension_numbers = #tpu.dot_dimension_numbers<[1], [0], [0], [1], [0, 0, 1, 1], [], []>} : vector<8x32xbf16>, vector<32x32xbf16>, vector<8x32xf32> -> vector<8x32xf32>
    %c0_19 = arith.constant 0 : index
    %c0_20 = arith.constant 0 : index
    %38 = vector.load %arg5[%c0_19, %c0_20] : memref<1x32xf32, #tpu.memory_space<vmem>>, vector<1x32xf32>
    %39 = vector.broadcast %38 : vector<1x32xf32> to vector<8x32xf32>
    %40 = arith.addf %37, %39 : vector<8x32xf32>
    %cst_21 = arith.constant dense<0.000000e+00> : vector<8xf32>
    %41 = vector.multi_reduction <add>, %40, %cst_21 [1] : vector<8x32xf32> to vector<8xf32>
    %42 = vector.shape_cast %41 : vector<8xf32> to vector<8x1xf32>
    %cst_22 = arith.constant 3.200000e+01 : f32
    %43 = vector.broadcast %cst_22 : f32 to vector<8x1xf32>
    %44 = arith.divf %42, %43 : vector<8x1xf32>
    %45 = vector.broadcast %44 : vector<8x1xf32> to vector<8x32xf32>
    %46 = arith.subf %40, %45 : vector<8x32xf32>
    %47 = arith.mulf %46, %46 : vector<8x32xf32>
    %cst_23 = arith.constant dense<0.000000e+00> : vector<8xf32>
    %48 = vector.multi_reduction <add>, %47, %cst_23 [1] : vector<8x32xf32> to vector<8xf32>
    %49 = vector.shape_cast %48 : vector<8xf32> to vector<8x1xf32>
    %cst_24 = arith.constant 3.200000e+01 : f32
    %50 = vector.broadcast %cst_24 : f32 to vector<8x1xf32>
    %51 = arith.divf %49, %50 : vector<8x1xf32>
    %52 = vector.broadcast %44 : vector<8x1xf32> to vector<8x32xf32>
    %53 = arith.subf %40, %52 : vector<8x32xf32>
    %cst_25 = arith.constant 9.99999974E-6 : f32
    %54 = vector.broadcast %cst_25 : f32 to vector<8x1xf32>
    %55 = arith.addf %51, %54 : vector<8x1xf32>
    %56 = math.rsqrt %55 : vector<8x1xf32>
    %57 = vector.broadcast %56 : vector<8x1xf32> to vector<8x32xf32>
    %58 = arith.mulf %53, %57 : vector<8x32xf32>
    %59 = vector.broadcast %0 : vector<1x32xf32> to vector<8x32xf32>
    %60 = arith.mulf %58, %59 : vector<8x32xf32>
    %61 = vector.broadcast %1 : vector<1x32xf32> to vector<8x32xf32>
    %62 = arith.addf %60, %61 : vector<8x32xf32>
    %cst_26 = arith.constant 0.000000e+00 : f32
    %63 = vector.broadcast %cst_26 : f32 to vector<8x32xf32>
    %64 = arith.cmpf ogt, %62, %63 : vector<8x32xf32>
    %cst_27 = arith.constant 2.000000e-01 : f32
    %65 = vector.broadcast %cst_27 : f32 to vector<8x32xf32>
    %66 = arith.mulf %65, %62 : vector<8x32xf32>
    %67 = arith.select %64, %62, %66 : vector<8x32xi1>, vector<8x32xf32>
    %68 = arith.truncf %67 : vector<8x32xf32> to vector<8x32xbf16>
    %c0_28 = arith.constant 0 : index
    %c0_29 = arith.constant 0 : index
    %69 = vector.load %arg6[%c0_28, %c0_29] : memref<32x32xbf16, #tpu.memory_space<vmem>>, vector<32x32xbf16>
    %cst_30 = arith.constant dense<0.000000e+00> : vector<8x32xf32>
    %70 = tpu.matmul %68, %69, %cst_30 {dimension_numbers = #tpu.dot_dimension_numbers<[1], [0], [0], [1], [0, 0, 1, 1], [], []>} : vector<8x32xbf16>, vector<32x32xbf16>, vector<8x32xf32> -> vector<8x32xf32>
    %c0_31 = arith.constant 0 : index
    %c0_32 = arith.constant 0 : index
    %71 = vector.load %arg7[%c0_31, %c0_32] : memref<1x32xf32, #tpu.memory_space<vmem>>, vector<1x32xf32>
    %72 = vector.broadcast %71 : vector<1x32xf32> to vector<8x32xf32>
    %73 = arith.addf %70, %72 : vector<8x32xf32>
    %cst_33 = arith.constant dense<0.000000e+00> : vector<8xf32>
    %74 = vector.multi_reduction <add>, %73, %cst_33 [1] : vector<8x32xf32> to vector<8xf32>
    %75 = vector.shape_cast %74 : vector<8xf32> to vector<8x1xf32>
    %cst_34 = arith.constant 3.200000e+01 : f32
    %76 = vector.broadcast %cst_34 : f32 to vector<8x1xf32>
    %77 = arith.divf %75, %76 : vector<8x1xf32>
    %78 = vector.broadcast %77 : vector<8x1xf32> to vector<8x32xf32>
    %79 = arith.subf %73, %78 : vector<8x32xf32>
    %80 = arith.mulf %79, %79 : vector<8x32xf32>
    %cst_35 = arith.constant dense<0.000000e+00> : vector<8xf32>
    %81 = vector.multi_reduction <add>, %80, %cst_35 [1] : vector<8x32xf32> to vector<8xf32>
    %82 = vector.shape_cast %81 : vector<8xf32> to vector<8x1xf32>
    %cst_36 = arith.constant 3.200000e+01 : f32
    %83 = vector.broadcast %cst_36 : f32 to vector<8x1xf32>
    %84 = arith.divf %82, %83 : vector<8x1xf32>
    %85 = vector.broadcast %77 : vector<8x1xf32> to vector<8x32xf32>
    %86 = arith.subf %73, %85 : vector<8x32xf32>
    %cst_37 = arith.constant 9.99999974E-6 : f32
    %87 = vector.broadcast %cst_37 : f32 to vector<8x1xf32>
    %88 = arith.addf %84, %87 : vector<8x1xf32>
    %89 = math.rsqrt %88 : vector<8x1xf32>
    %90 = vector.broadcast %89 : vector<8x1xf32> to vector<8x32xf32>
    %91 = arith.mulf %86, %90 : vector<8x32xf32>
    %92 = vector.broadcast %0 : vector<1x32xf32> to vector<8x32xf32>
    %93 = arith.mulf %91, %92 : vector<8x32xf32>
    %94 = vector.broadcast %1 : vector<1x32xf32> to vector<8x32xf32>
    %95 = arith.addf %93, %94 : vector<8x32xf32>
    %cst_38 = arith.constant 0.000000e+00 : f32
    %96 = vector.broadcast %cst_38 : f32 to vector<8x32xf32>
    %97 = arith.cmpf ogt, %95, %96 : vector<8x32xf32>
    %cst_39 = arith.constant 2.000000e-01 : f32
    %98 = vector.broadcast %cst_39 : f32 to vector<8x32xf32>
    %99 = arith.mulf %98, %95 : vector<8x32xf32>
    %100 = arith.select %97, %95, %99 : vector<8x32xi1>, vector<8x32xf32>
    %101 = arith.truncf %100 : vector<8x32xf32> to vector<8x32xbf16>
    %c0_40 = arith.constant 0 : index
    %c0_41 = arith.constant 0 : index
    %102 = vector.load %arg8[%c0_40, %c0_41] : memref<32x32xbf16, #tpu.memory_space<vmem>>, vector<32x32xbf16>
    %cst_42 = arith.constant dense<0.000000e+00> : vector<8x32xf32>
    %103 = tpu.matmul %101, %102, %cst_42 {dimension_numbers = #tpu.dot_dimension_numbers<[1], [0], [0], [1], [0, 0, 1, 1], [], []>} : vector<8x32xbf16>, vector<32x32xbf16>, vector<8x32xf32> -> vector<8x32xf32>
    %c0_43 = arith.constant 0 : index
    %c0_44 = arith.constant 0 : index
    %104 = vector.load %arg9[%c0_43, %c0_44] : memref<1x32xf32, #tpu.memory_space<vmem>>, vector<1x32xf32>
    %105 = vector.broadcast %104 : vector<1x32xf32> to vector<8x32xf32>
    %106 = arith.addf %103, %105 : vector<8x32xf32>
    %cst_45 = arith.constant dense<0.000000e+00> : vector<8xf32>
    %107 = vector.multi_reduction <add>, %106, %cst_45 [1] : vector<8x32xf32> to vector<8xf32>
    %108 = vector.shape_cast %107 : vector<8xf32> to vector<8x1xf32>
    %cst_46 = arith.constant 3.200000e+01 : f32
    %109 = vector.broadcast %cst_46 : f32 to vector<8x1xf32>
    %110 = arith.divf %108, %109 : vector<8x1xf32>
    %111 = vector.broadcast %110 : vector<8x1xf32> to vector<8x32xf32>
    %112 = arith.subf %106, %111 : vector<8x32xf32>
    %113 = arith.mulf %112, %112 : vector<8x32xf32>
    %cst_47 = arith.constant dense<0.000000e+00> : vector<8xf32>
    %114 = vector.multi_reduction <add>, %113, %cst_47 [1] : vector<8x32xf32> to vector<8xf32>
    %115 = vector.shape_cast %114 : vector<8xf32> to vector<8x1xf32>
    %cst_48 = arith.constant 3.200000e+01 : f32
    %116 = vector.broadcast %cst_48 : f32 to vector<8x1xf32>
    %117 = arith.divf %115, %116 : vector<8x1xf32>
    %118 = vector.broadcast %110 : vector<8x1xf32> to vector<8x32xf32>
    %119 = arith.subf %106, %118 : vector<8x32xf32>
    %cst_49 = arith.constant 9.99999974E-6 : f32
    %120 = vector.broadcast %cst_49 : f32 to vector<8x1xf32>
    %121 = arith.addf %117, %120 : vector<8x1xf32>
    %122 = math.rsqrt %121 : vector<8x1xf32>
    %123 = vector.broadcast %122 : vector<8x1xf32> to vector<8x32xf32>
    %124 = arith.mulf %119, %123 : vector<8x32xf32>
    %125 = vector.broadcast %0 : vector<1x32xf32> to vector<8x32xf32>
    %126 = arith.mulf %124, %125 : vector<8x32xf32>
    %127 = vector.broadcast %1 : vector<1x32xf32> to vector<8x32xf32>
    %128 = arith.addf %126, %127 : vector<8x32xf32>
    %cst_50 = arith.constant 0.000000e+00 : f32
    %129 = vector.broadcast %cst_50 : f32 to vector<8x32xf32>
    %130 = arith.cmpf ogt, %128, %129 : vector<8x32xf32>
    %cst_51 = arith.constant 2.000000e-01 : f32
    %131 = vector.broadcast %cst_51 : f32 to vector<8x32xf32>
    %132 = arith.mulf %131, %128 : vector<8x32xf32>
    %133 = arith.select %130, %128, %132 : vector<8x32xi1>, vector<8x32xf32>
    %134 = arith.truncf %133 : vector<8x32xf32> to vector<8x32xbf16>
    %c0_52 = arith.constant 0 : index
    %c0_53 = arith.constant 0 : index
    %135 = vector.load %arg10[%c0_52, %c0_53] : memref<32x2xbf16, #tpu.memory_space<vmem>>, vector<32x2xbf16>
    %cst_54 = arith.constant dense<0.000000e+00> : vector<8x2xf32>
    %136 = tpu.matmul %134, %135, %cst_54 {dimension_numbers = #tpu.dot_dimension_numbers<[1], [0], [0], [1], [0, 0, 1, 1], [], []>} : vector<8x32xbf16>, vector<32x2xbf16>, vector<8x2xf32> -> vector<8x2xf32>
    %c0_55 = arith.constant 0 : index
    %c0_56 = arith.constant 0 : index
    %137 = vector.load %arg11[%c0_55, %c0_56] : memref<1x2xf32, #tpu.memory_space<vmem>>, vector<1x2xf32>
    %138 = vector.broadcast %137 : vector<1x2xf32> to vector<8x2xf32>
    %139 = arith.addf %136, %138 : vector<8x2xf32>
    %140 = tpu.weird %139 : vector<8x2xf32> -> vector<8x2xi1>
    %cst_57 = arith.constant dense<true> : vector<8x2xi1>
    %141 = arith.xori %140, %cst_57 : vector<8x2xi1>
    %cst_58 = arith.constant 1.000000e+00 : f32
    %142 = vector.broadcast %cst_58 : f32 to vector<8x2xf32>
    %cst_59 = arith.constant 0x7FC00000 : f32
    %143 = vector.broadcast %cst_59 : f32 to vector<8x2xf32>
    %144 = arith.select %141, %142, %143 : vector<8x2xi1>, vector<8x2xf32>
    %c0_60 = arith.constant 0 : index
    %c0_61 = arith.constant 0 : index
    %145 = vector.load %arg14[%c0_60, %c0_61] : memref<8x2xf32, #tpu.memory_space<vmem>>, vector<8x2xf32>
    tpu.vector_store %arg14[%c0_60, %c0_61], %144 {strides = array<i32>} : memref<8x2xf32, #tpu.memory_space<vmem>>, vector<8x2xf32>,
    return
  }
  func.func @transform_0(%arg0: i32) -> (i32, i32) {
    %c0_i32 = arith.constant 0 : i32
    %c0_i32_0 = arith.constant 0 : i32
    return %arg0, %c0_i32 : i32, i32
  }
  func.func @transform_1(%arg0: i32) -> (i32, i32) {
    %c0_i32 = arith.constant 0 : i32
    %c0_i32_0 = arith.constant 0 : i32
    %c0_i32_1 = arith.constant 0 : i32
    return %c0_i32, %c0_i32_0 : i32, i32
  }
  func.func @transform_2(%arg0: i32) -> (i32, i32) {
    %c0_i32 = arith.constant 0 : i32
    %c0_i32_0 = arith.constant 0 : i32
    %c0_i32_1 = arith.constant 0 : i32
    return %c0_i32, %c0_i32_0 : i32, i32
  }
  func.func @transform_3(%arg0: i32) -> (i32, i32) {
    %c0_i32 = arith.constant 0 : i32
    %c0_i32_0 = arith.constant 0 : i32
    %c0_i32_1 = arith.constant 0 : i32
    return %c0_i32, %c0_i32_0 : i32, i32
  }
  func.func @transform_4(%arg0: i32) -> (i32, i32) {
    %c0_i32 = arith.constant 0 : i32
    %c0_i32_0 = arith.constant 0 : i32
    %c0_i32_1 = arith.constant 0 : i32
    return %c0_i32, %c0_i32_0 : i32, i32
  }
  func.func @transform_5(%arg0: i32) -> (i32, i32) {
    %c0_i32 = arith.constant 0 : i32
    %c0_i32_0 = arith.constant 0 : i32
    %c0_i32_1 = arith.constant 0 : i32
    return %c0_i32, %c0_i32_0 : i32, i32
  }
  func.func @transform_6(%arg0: i32) -> (i32, i32) {
    %c0_i32 = arith.constant 0 : i32
    %c0_i32_0 = arith.constant 0 : i32
    %c0_i32_1 = arith.constant 0 : i32
    return %c0_i32, %c0_i32_0 : i32, i32
  }
  func.func @transform_7(%arg0: i32) -> (i32, i32) {
    %c0_i32 = arith.constant 0 : i32
    %c0_i32_0 = arith.constant 0 : i32
    %c0_i32_1 = arith.constant 0 : i32
    return %c0_i32, %c0_i32_0 : i32, i32
  }
  func.func @transform_8(%arg0: i32) -> (i32, i32) {
    %c0_i32 = arith.constant 0 : i32
    %c0_i32_0 = arith.constant 0 : i32
    %c0_i32_1 = arith.constant 0 : i32
    return %c0_i32, %c0_i32_0 : i32, i32
  }
  func.func @transform_9(%arg0: i32) -> (i32, i32) {
    %c0_i32 = arith.constant 0 : i32
    %c0_i32_0 = arith.constant 0 : i32
    %c0_i32_1 = arith.constant 0 : i32
    return %c0_i32, %c0_i32_0 : i32, i32
  }
  func.func @transform_10(%arg0: i32) -> (i32, i32) {
    %c0_i32 = arith.constant 0 : i32
    %c0_i32_0 = arith.constant 0 : i32
    %c0_i32_1 = arith.constant 0 : i32
    return %c0_i32, %c0_i32_0 : i32, i32
  }
  func.func @transform_11(%arg0: i32) -> (i32, i32) {
    %c0_i32 = arith.constant 0 : i32
    %c0_i32_0 = arith.constant 0 : i32
    %c0_i32_1 = arith.constant 0 : i32
    return %c0_i32, %c0_i32_0 : i32, i32
  }
  func.func @transform_12(%arg0: i32) -> (i32, i32) {
    %c0_i32 = arith.constant 0 : i32
    %c0_i32_0 = arith.constant 0 : i32
    %c0_i32_1 = arith.constant 0 : i32
    return %c0_i32, %c0_i32_0 : i32, i32
  }
  func.func @transform_13(%arg0: i32) -> (i32, i32) {
    %c0_i32 = arith.constant 0 : i32
    %c0_i32_0 = arith.constant 0 : i32
    return %arg0, %c0_i32 : i32, i32
  }
}

</mosaic_0001>

<bundles_post_ra>
// kernel: tpu_custom_call.1
= control target key start
LH: loop header
LB: loop body
LE: loop exit
PB: predicated region body
PF: predicated region fallthrough
CT: control target
= control target key end

     0   :  { %s1503_s0 = inlined_call_operand.hbm [shape: bf16[16,16], index: 0, kind: input, shape index: {}]   ;;  %s1504_s1 = inlined_call_operand.hbm [shape: bf16[16,32], index: 1, kind: input, shape index: {}]   ;;  %s1505_s2 = inlined_call_operand.vmem [shape: f32[1,32], index: 2, kind: input, shape index: {}]   ;;  %s1506_s3 = inlined_call_operand.vmem [shape: bf16[32,32], index: 3, kind: input, shape index: {}]   ;;  %s1507_s4 = inlined_call_operand.vmem [shape: f32[1,32], index: 4, kind: input, shape index: {}]   ;;  %s1508_s5 = inlined_call_operand.hbm [shape: bf16[32,32], index: 5, kind: input, shape index: {}]   ;;  %s1509_s6 = inlined_call_operand.vmem [shape: f32[1,32], index: 6, kind: input, shape index: {}]   ;;  %s1510_s7 = inlined_call_operand.hbm [shape: bf16[32,32], index: 7, kind: input, shape index: {}]   ;;  %s1511_s8 = inlined_call_operand.vmem [shape: f32[1,32], index: 8, kind: input, shape index: {}]   ;;  %s1512_s9 = inlined_call_operand.vmem [shape: bf16[32,2], index: 9, kind: input, shape index: {}]   ;;  %s1513_s10 = inlined_call_operand.vmem [shape: f32[1,2], index: 10, kind: input, shape index: {}]   ;;  %s1514_s11 = inlined_call_operand.vmem [shape: f32[1,32], index: 11, kind: input, shape index: {}]   ;;  %s1515_s12 = inlined_call_operand.vmem [shape: f32[1,32], index: 12, kind: input, shape index: {}]   ;;  %s1516_s13 = inlined_call_operand.vmem [shape: f32[16,2], index: 13, kind: output, shape index: {}]  }
   0x1   :  { %1517 = sst [smem:[#allocation13_spill]] %s1504_s1 }
   0x2   :  { %1518 = sst [smem:[#allocation14_spill]] %s1508_s5 }
   0x3   :  { %1519 = sst [smem:[#allocation15_spill]] %s1510_s7 }
   0x4   :  { %18 = vsyncpa [#allocation3], 0 }
   0x5   :  { %20 = vsyncpa [#allocation3 + $0x1], 0 }
   0x6   :  { %21 = vsyncpa [#allocation5], 0 }
   0x7   :  { %22 = vsyncpa [#allocation8], 0  ;;  %s1310_s25 = smov 0   ;;  %s1312_s26 = smov 0  }
   0x8   :  { %s1314_s27 = smov 0   ;;  %s1316_s28 = smov 0  }
   0x9 LB: > { %s1520_s1 = sld [smem:[#allocation13_spill]]  ;;  %s1334_s15 = sadd.s32 4294967295, %s1230_s28   ;;  %s1230_s28 = sphi %s1316_s28, %s1532_s28   ;;  %s1226_s27 = sphi %s1314_s27, %s1531_s27   ;;  %s1222_s26 = sphi %s1312_s26, %s1530_s26   ;;  %s1218_s25 = sphi %s1310_s25, %s1529_s25  }
   0xa   : > { %p911_p0 = scmp.ge.s32.totalorder %s1230_s28, 1  ;;  %p49_p1 = scmp.eq.s32.totalorder %s1334_s15, 0 }
   0xb   : > { %p337_p2 = scmp.lt.s32.totalorder %s1230_s28, 3  ;;  %s1232_s17 = smov [#allocation4]  }
   0xc   : > { %s350_s18 = sshll.u32 %s1232_s17, 4  ;;  %s1522_s5 = sld [smem:[#allocation14_spill]]  ;;  %s351_s18 = int_to_ptr.vmem [resolvable:$true] %s350_s18 }
   0xd   : > { %p1339_p3 = pnand %p911_p0, %p337_p2  ;;  %s1524_s7 = sld [smem:[#allocation15_spill]] }
   0xe   : > { %s1233_s30 = smov [#allocation6]   ;;  %s1234_s19 = smov 64  }
   0xf   : > { %s348_s14 = sshll.u32 %s1520_s1, 4  ;;  %p990_p4 = pneg %p1339_p3  ;;  %s349_s14 = int_to_ptr.hbm [resolvable:$true] %s348_s14 }
  0x10   : > { %s373_s17 = sshll.u32 %s1233_s30, 4  ;;  %s1235_s20 = smov 4   ;;  %s374_s17 = int_to_ptr.vmem [resolvable:$true] %s373_s17 }
  0x11   : > { %p1350_p5 = pnand %p990_p4, %p49_p1  ;;  %s1236_s23 = smov [#allocation7]  }
  0x12   : > { %s371_s21 = sshll.u32 %s1522_s5, 4  ;;  %s390_s24 = sshll.u32 %s1236_s23, 4  ;;  %s372_s21 = int_to_ptr.hbm [resolvable:$true] %s371_s21  ;;  %s391_s24 = int_to_ptr.vmem [resolvable:$true] %s390_s24 }
  0x13   : > { %s388_s29 = sshll.u32 %s1524_s7, 4  ;;  %s1364_s30 = sadd.s32 1, %s1230_s28   ;;  %s389_s29 = int_to_ptr.hbm [resolvable:$true] %s388_s29 }
  0x14   : > { %993 = dma.hbm_to_vmem [thread:$0]  (!%p1350_p5), %s349_s14, 128, %s351_s18, [#allocation5], %s1234_s19, %s1234_s19, %s1235_s20  }
  0x15   : > { %996 = dma.hbm_to_vmem [thread:$0]  (!%p1350_p5), %s372_s21, 256, %s374_s17, [#allocation5], %s1234_s19, %s1234_s19, %s1235_s20  }
  0x16   : > { %999 = dma.hbm_to_vmem [thread:$0]  (!%p1350_p5), %s389_s29, 256, %s391_s24, [#allocation8], %s1234_s19, %s1234_s19, %s1235_s20  }
  0x17   : > { %s32_s1 = ssub.s32 %s1230_s28, %s1364_s30  ;;  %s35_s5 = sadd.s32 1, %s1226_s27 }
  0x18   : > { %p33_p6 = scmp.eq.s32.totalorder %s32_s1, 0  ;;  %p42_p7 = scmp.ne.s32.totalorder %s1226_s27, %s1222_s26 }
  0x19   : > { %p43_p8 = scmp.eq.s32.totalorder %s1230_s28, 0  ;;  %p48_p9 = scmp.ne.s32.totalorder %s1222_s26, %s1218_s25 }
  0x1a   : > { %s1375_s14 = scalar_select %p33_p6, %s1226_s27, %s35_s5  }
  0x1b   : > { %p44_p10 = por %p43_p8, %p42_p7  ;;  %p1379_p11 = por %p49_p1, %p48_p9 }
  0x1c   : > { %1525 = sst [smem:[#allocation12_spill]] %s1375_s14  ;;  %p1007_p12 = scmp.lt.s32.totalorder %s1230_s28, 2 }
  0x1d   : > { %s419_s21 = sand.u32 1, %s1226_s27   ;;  %s917_s29 = sshll.u32 %s1230_s28, 2 }
  0x1e   : > { %s916_s22 = sshll.u32 %s419_s21, 2  ;;  %s427_s20 = scalar_lea.hbm %s1503_s0, %s917_s29 }
  0x1f   : > { %s423_s1 = scalar_lea.vmem [#allocation2], %s916_s22  ;;  %s429_s24 = sshll.u32 %s427_s20, 4  ;;  %s430_s24 = int_to_ptr.hbm [resolvable:$true] %s429_s24 }
  0x20   : > { %s431_s23 = sshll.u32 %s423_s1, 4  ;;  %p1389_p13 = pnand %p1007_p12, %p44_p10  ;;  %s432_s23 = int_to_ptr.vmem [resolvable:$true] %s431_s23 }
  0x21   : > { %s420_s25 = scalar_lea.sflag [#allocation3], %s419_s21  ;;  %s1158_s7 = sshra.s32 %s430_s24, 4  ;;  %s1159_s7 = int_to_ptr.hbm [resolvable:$true] %s1158_s7 }
  0x22   : > { %s1160_s14 = scalar_lea.hbm %s1159_s7, 4  ;;  %p1162_p2 = pneg %p1389_p13 }
  0x23   : > { %p1161_p0 = scmp.ne.s32.totalorder %s1159_s7, %s1160_s14  ;;  %s1165_s29 = scalar_lea.hbm %s1503_s0, 8 }
  0x24   : > { %p1166_p6 = scmp.lt.s32.totalorder %s1159_s7, %s1503_s0  ;;  %p1167_p7 = scmp.lt.s32.totalorder %s1165_s29, %s1160_s14 }
  0x25   : > { %p1163_p4 = pnand %p1162_p2, %p1161_p0 }
  0x26   : > { %p1168_p8 = por %p1167_p7, %p1166_p6 }
  0x27   : > { %p1164_p5 = pneg %p1163_p4 }
  0x29   : > { %p1169_p9 = pnand %p1168_p8, %p1164_p5 }
  0x2b   : > { %1172 = shalt.err (!%p1169_p9)
}
  0x2c   : > { %1003 = dma.hbm_to_vmem [thread:$0]  (!%p1389_p13), %s430_s24, 64, %s432_s23, %s420_s25  }
  0x2d   : > { %440 = sbr.rel (%p1339_p3) target bundleno = 1809 (0x711), region = 72  ;;  %s442_s21 = sand.u32 (!%p1339_p3), 1, %s1222_s26  }
  0x2e   : > { %s919_s20 = sshll.u32 (!%p1339_p3), %s442_s21, 2  ;;  %s443_s1 = scalar_lea.sflag (!%p1339_p3), [#allocation3], %s442_s21 }
  0x2f   : > { %s446_s28 = scalar_lea.vmem (!%p1339_p3), [#allocation2], %s919_s20 }
  0x32   : > { %1205 = dma.done.wait (%p1379_p11), %s443_s1, 64  }
  0x33   : > { %1207 = vsyncadd (%p1379_p11), %s443_s1, 4294967232 }
  0x34   : > { %1209 = dma.done.wait (%p49_p1), [#allocation5], 384  }
  0x35   : > { %1211 = vsyncadd (%p49_p1), [#allocation5], 4294966912 }
  0x36   : > { %1213 = dma.done.wait (%p49_p1), [#allocation8], 256  }
  0x37   : > { %1215 = vsyncadd (%p49_p1), [#allocation8], 4294967040  ;;  %v967_v0 = vld [vmem:[#allocation4] sm:$0xff]  ;;  %vm524_vm0 = vcmask 130048   ;;  %v511_v1 = vld [vmem:[%s446_s28] sm:$0xf] }
  0x38   : > { %535 = vmatpush.bf16.msra.mxu0 %v967_v0  ;;  %v1051_v2 = vld [vmem:[%s1505_s2] ss:$0 sm:$0xff]  ;;  %vm541_vm1 = vcmask 261120   ;;  %v1237_v7 = vmov 32.0   ;;  %v969_v19 = vld [vmem:[%s1506_s3 + $0x8] sm:$0xff]  ;;  %v971_v49 = vld [vmem:[#allocation6 + $0x8] sm:$0xff] }
  0x39   : > { %1058 = vrcp.f32 %v1237_v7  ;;  %612 = vmatpush.bf16.msra.mxu1 %v969_v19  ;;  %v968_v20 = vld [vmem:[%s1506_s3] sm:$0xff]  ;;  %676 = vmatpush.bf16.msra.mxu2 %v971_v49  ;;  %v970_v50 = vld [vmem:[#allocation6] sm:$0xff]  ;;  %p504_p1 = scmp.lt.s32.totalorder %s1334_s15, 1 }
  0x3a   : > { %v1436_v30 = vld [vmem:[%s1514_s11] ss:$0 sm:$0xff] }
  0x3b   : > { %928 = vmatmul.msk.bf16.vlgmr.msra.gmra.mxu0 %vm524_vm0, %v511_v1  ;;  %v1441_v33 = vld [vmem:[%s1515_s12] ss:$0 sm:$0xff]  ;;  %s1534_s15 = smov (!%p504_p1, %s1334_s15), 1 }
  0x3c   : > { %v1054_v39 = vld [vmem:[%s1507_s4] ss:$0 sm:$0xff]  ;;  %s923_s5 = sshll.u32 %s1534_s15, 3 }
  0x3d   : > { %613 = vmatpush.bf16.msra.mxu1 %v968_v20  ;;  %677 = vmatpush.bf16.msra.mxu2 %v970_v50  ;;  %s507_s29 = scalar_lea.vmem %s1516_s13, %s923_s5 }
  0x3f   : > { %v1059_v8 = vpop.eup %1058 }
  0x40   : > { %v546_v9 = vmul.f32 32.0, %v1059_v8  ;;  %vm550_vm2 = vweird.f32 %v1059_v8 }
  0x42   : > { %v547_v10 = vsub.f32 1.0, %v546_v9 }
  0x44   : > { %v548_v11 = vmul.f32 %v1059_v8, %v547_v10 }
  0x46   : > { %v549_v12 = vadd.f32 %v1059_v8, %v548_v11 }
  0x48   : > { %v1422_v13 = vsel %vm550_vm2, %v1059_v8, %v549_v12 }
  0xb8   : > { %v537_v3 = vpop.f32.mrf.mxu0 }
  0xb9   : > { %v538_v4 = vadd.f32 %v1051_v2, %v537_v3  ;;  %v1055_v3 = vld [vmem:[%s1509_s6] ss:$0 sm:$0xff] }
  0xbb   : > { %v542_v5 = vsel %vm541_vm1, %v538_v4, 0.0 }
  0xbc   : > { %543 = vadd.xlane.f32.xlu0 %v542_v5 }
  0xc0   : > { %v539_v6 = vpop.f32.mrf.mxu0 }
 0x12f   : > { %v544_v14 = vpop.xlane.xlu0 %543 }
 0x130   : > { %v552_v15 = vmul.f32 %v1422_v13, %v544_v14  ;;  %v973_v14 = vld [vmem:[#allocation7 + $0x8] sm:$0xff] }
 0x131   : > { %740 = vmatpush.bf16.msra.mxu3 %v973_v14 }
 0x132   : > { %v553_v16 = vsub.f32 %v538_v4, %v552_v15  ;;  %v972_v15 = vld [vmem:[#allocation7] sm:$0xff] }
 0x134   : > { %v554_v17 = vmul.f32 %v553_v16, %v553_v16 }
 0x135   : > { %741 = vmatpush.bf16.msra.mxu3 %v972_v15 }
 0x136   : > { %v555_v18 = vsel %vm541_vm1, %v554_v17, 0.0 }
 0x137   : > { %556 = vadd.xlane.f32.xlu0 %v555_v18 }
 0x1aa   : > { %v557_v21 = vpop.xlane.xlu0 %556 }
 0x1ab   : > { %v558_v22 = vmul.f32 %v557_v21, %v1422_v13 }
 0x1ad   : > { %v559_v23 = vadd.f32 1e-05, %v558_v22 }
 0x1af   : > { %1060 = vrsqrt.f32 %v559_v23  ;;  %vm566_vm4 = vweird.f32 %v559_v23 }
 0x1b5   : > { %v1061_v24 = vpop.eup %1060 }
 0x1b6   : > { %v561_v25 = vmul.f32 %v1061_v24, %v559_v23  ;;  %vm567_vm3 = vweird.f32 %v1061_v24 }
 0x1b7   : > { %vm568_vm5 = vmor %vm566_vm4, %vm567_vm3 }
 0x1b8   : > { %v562_v26 = vmul.f32 %v1061_v24, %v561_v25 }
 0x1ba   : > { %v563_v27 = vmul.f32 0.5, %v562_v26 }
 0x1bc   : > { %v564_v28 = vsub.f32 1.5, %v563_v27 }
 0x1be   : > { %v565_v29 = vmul.f32 %v1061_v24, %v564_v28 }
 0x1c0   : > { %v569_v31 = vsel %vm568_vm5, %v1061_v24, %v565_v29  ;;  %vm814_vm5 = vcmask 15360  }
 0x1c1   : > { %v570_v32 = vmul.f32 %v569_v31, %v553_v16 }
 0x1c3   : > { %v574_v34 = vmul.f32 %v1436_v30, %v570_v32 }
 0x1c5   : > { %v578_v35 = vadd.f32 %v1441_v33, %v574_v34  ;;  %v1056_v34 = vld [vmem:[%s1511_s8] ss:$0 sm:$0xff] }
 0x1c7   : > { %vm579_vm6 = vcmp.gt.f32.partialorder %v578_v35, 0.0  ;;  %v580_v36 = vmul.f32 0.2, %v578_v35 }
 0x1c9   : > { %v581_v37 = vsel %vm579_vm6, %v578_v35, %v580_v36  ;;  %vm1238_vm6 = vmmov 1  }
 0x1ca   : > { %v582_v38 = vpack.c.bf16 %v581_v37, %v581_v37 }
 0x1cc   : > { %937 = vmatmul.msk.bf16.vlgmr.msra.gmra.mxu1 %vm541_vm1, %v582_v38 }
 0x249   : > { %v615_v40 = vpop.f32.mrf.mxu1 }
 0x24a   : > { %v616_v41 = vadd.f32 %v1054_v39, %v615_v40 }
 0x24c   : > { %v619_v42 = vsel %vm541_vm1, %v616_v41, 0.0 }
 0x24d   : > { %620 = vadd.xlane.f32.xlu1 %v619_v42 }
 0x251   : > { %v617_v43 = vpop.f32.mrf.mxu1 }
 0x2c0   : > { %v621_v44 = vpop.xlane.xlu1 %620 }
 0x2c1   : > { %v622_v45 = vmul.f32 %v621_v44, %v1422_v13  ;;  %v975_v44 = vld [vmem:[%s1512_s9 + $0x8] sm:$0xff] }
 0x2c2   : > { %804 = vmatpush.bf16.msrb.mxu0 %v975_v44 }
 0x2c3   : > { %v623_v46 = vsub.f32 %v616_v41, %v622_v45  ;;  %v974_v45 = vld [vmem:[%s1512_s9] sm:$0xff] }
 0x2c5   : > { %v624_v47 = vmul.f32 %v623_v46, %v623_v46 }
 0x2c6   : > { %805 = vmatpush.bf16.msrb.mxu0 %v974_v45 }
 0x2c7   : > { %v625_v48 = vsel %vm541_vm1, %v624_v47, 0.0 }
 0x2c8   : > { %626 = vadd.xlane.f32.xlu1 %v625_v48 }
 0x33b   : > { %v627_v51 = vpop.xlane.xlu1 %626 }
 0x33c   : > { %v628_v52 = vmul.f32 %v627_v51, %v1422_v13 }
 0x33e   : > { %v629_v53 = vadd.f32 1e-05, %v628_v52 }
 0x340   : > { %1062 = vrsqrt.f32 %v629_v53  ;;  %vm636_vm8 = vweird.f32 %v629_v53 }
 0x346   : > { %v1063_v54 = vpop.eup %1062 }
 0x347   : > { %v631_v55 = vmul.f32 %v1063_v54, %v629_v53  ;;  %vm637_vm7 = vweird.f32 %v1063_v54 }
 0x348   : > { %vm638_vm9 = vmor %vm636_vm8, %vm637_vm7 }
 0x349   : > { %v632_v56 = vmul.f32 %v1063_v54, %v631_v55 }
 0x34b   : > { %v633_v57 = vmul.f32 0.5, %v632_v56 }
 0x34d   : > { %v634_v58 = vsub.f32 1.5, %v633_v57 }
 0x34f   : > { %v635_v59 = vmul.f32 %v1063_v54, %v634_v58 }
 0x351   : > { %v639_v60 = vsel %vm638_vm9, %v1063_v54, %v635_v59 }
 0x352   : > { %v640_v61 = vmul.f32 %v639_v60, %v623_v46 }
 0x354   : > { %v641_v62 = vmul.f32 %v1436_v30, %v640_v61  ;;  %v1057_v61 = vld [vmem:[%s1513_s10] ss:$0 sm:$0xff] }
 0x356   : > { %v642_v63 = vadd.f32 %v1441_v33, %v641_v62 }
 0x358   : > { %vm643_vm10 = vcmp.gt.f32.partialorder %v642_v63, 0.0  ;;  %v644_v0 = vmul.f32 0.2, %v642_v63 }
 0x35a   : > { %v645_v1 = vsel %vm643_vm10, %v642_v63, %v644_v0 }
 0x35b   : > { %v646_v2 = vpack.c.bf16 %v645_v1, %v645_v1 }
 0x35d   : > { %946 = vmatmul.msk.bf16.vlgmr.msra.gmra.mxu2 %vm541_vm1, %v646_v2 }
 0x3e0   : > { %v679_v4 = vpop.f32.mrf.mxu2 }
 0x3e1   : > { %v680_v5 = vadd.f32 %v1055_v3, %v679_v4 }
 0x3e3   : > { %v683_v6 = vsel %vm541_vm1, %v680_v5, 0.0 }
 0x3e4   : > { %684 = vadd.xlane.f32.xlu2 %v683_v6 }
 0x3e8   : > { %v681_v7 = vpop.f32.mrf.mxu2 }
 0x457   : > { %v685_v8 = vpop.xlane.xlu2 %684 }
 0x458   : > { %v686_v9 = vmul.f32 %v685_v8, %v1422_v13 }
 0x45a   : > { %v687_v10 = vsub.f32 %v680_v5, %v686_v9 }
 0x45c   : > { %v688_v11 = vmul.f32 %v687_v10, %v687_v10 }
 0x45e   : > { %v689_v12 = vsel %vm541_vm1, %v688_v11, 0.0 }
 0x45f   : > { %690 = vadd.xlane.f32.xlu2 %v689_v12 }
 0x4d2   : > { %v691_v16 = vpop.xlane.xlu2 %690 }
 0x4d3   : > { %v692_v17 = vmul.f32 %v691_v16, %v1422_v13 }
 0x4d5   : > { %v693_v18 = vadd.f32 1e-05, %v692_v17 }
 0x4d7   : > { %1064 = vrsqrt.f32 %v693_v18  ;;  %vm700_vm12 = vweird.f32 %v693_v18 }
 0x4dd   : > { %v1065_v19 = vpop.eup %1064 }
 0x4de   : > { %v695_v20 = vmul.f32 %v1065_v19, %v693_v18  ;;  %vm701_vm11 = vweird.f32 %v1065_v19 }
 0x4df   : > { %vm702_vm13 = vmor %vm700_vm12, %vm701_vm11 }
 0x4e0   : > { %v696_v21 = vmul.f32 %v1065_v19, %v695_v20 }
 0x4e2   : > { %v697_v22 = vmul.f32 0.5, %v696_v21 }
 0x4e4   : > { %v698_v23 = vsub.f32 1.5, %v697_v22 }
 0x4e6   : > { %v699_v24 = vmul.f32 %v1065_v19, %v698_v23 }
 0x4e8   : > { %v703_v25 = vsel %vm702_vm13, %v1065_v19, %v699_v24 }
 0x4e9   : > { %v704_v26 = vmul.f32 %v703_v25, %v687_v10 }
 0x4eb   : > { %v705_v27 = vmul.f32 %v1436_v30, %v704_v26 }
 0x4ed   : > { %v706_v28 = vadd.f32 %v1441_v33, %v705_v27 }
 0x4ef   : > { %vm707_vm14 = vcmp.gt.f32.partialorder %v706_v28, 0.0  ;;  %v708_v29 = vmul.f32 0.2, %v706_v28 }
 0x4f1   : > { %v709_v31 = vsel %vm707_vm14, %v706_v28, %v708_v29 }
 0x4f2   : > { %v710_v32 = vpack.c.bf16 %v709_v31, %v709_v31 }
 0x4f4   : > { %955 = vmatmul.msk.bf16.vlgmr.msra.gmra.mxu3 %vm541_vm1, %v710_v32 }
 0x577   : > { %v743_v35 = vpop.f32.mrf.mxu3 }
 0x578   : > { %v744_v36 = vadd.f32 %v1056_v34, %v743_v35 }
 0x57a   : > { %v747_v37 = vsel %vm541_vm1, %v744_v36, 0.0 }
 0x57b   : > { %748 = vadd.xlane.f32.xlu0 %v747_v37 }
 0x57f   : > { %v745_v38 = vpop.f32.mrf.mxu3 }
 0x5ee   : > { %v749_v39 = vpop.xlane.xlu0 %748 }
 0x5ef   : > { %v750_v40 = vmul.f32 %v749_v39, %v1422_v13 }
 0x5f1   : > { %v751_v41 = vsub.f32 %v744_v36, %v750_v40 }
 0x5f3   : > { %v752_v42 = vmul.f32 %v751_v41, %v751_v41 }
 0x5f5   : > { %v753_v43 = vsel %vm541_vm1, %v752_v42, 0.0 }
 0x5f6   : > { %754 = vadd.xlane.f32.xlu1 %v753_v43 }
 0x669   : > { %v755_v46 = vpop.xlane.xlu1 %754 }
 0x66a   : > { %v756_v47 = vmul.f32 %v755_v46, %v1422_v13 }
 0x66c   : > { %v757_v48 = vadd.f32 1e-05, %v756_v47 }
 0x66e   : > { %1066 = vrsqrt.f32 %v757_v48  ;;  %vm764_vm0 = vweird.f32 %v757_v48 }
 0x674   : > { %v1067_v49 = vpop.eup %1066 }
 0x675   : > { %v759_v50 = vmul.f32 %v1067_v49, %v757_v48  ;;  %vm765_vm15 = vweird.f32 %v1067_v49 }
 0x676   : > { %vm766_vm2 = vmor %vm764_vm0, %vm765_vm15 }
 0x677   : > { %v760_v51 = vmul.f32 %v1067_v49, %v759_v50 }
 0x679   : > { %v761_v52 = vmul.f32 0.5, %v760_v51 }
 0x67b   : > { %v762_v53 = vsub.f32 1.5, %v761_v52 }
 0x67d   : > { %v763_v54 = vmul.f32 %v1067_v49, %v762_v53 }
 0x67f   : > { %v767_v55 = vsel %vm766_vm2, %v1067_v49, %v763_v54 }
 0x680   : > { %v768_v56 = vmul.f32 %v767_v55, %v751_v41 }
 0x682   : > { %v769_v57 = vmul.f32 %v1436_v30, %v768_v56  ;;  %v1239_v30 = vmov nan  }
 0x684   : > { %v770_v58 = vadd.f32 %v1441_v33, %v769_v57 }
 0x686   : > { %vm771_vm3 = vcmp.gt.f32.partialorder %v770_v58, 0.0  ;;  %v772_v13 = vmul.f32 0.2, %v770_v58 }
 0x688   : > { %v773_v59 = vsel %vm771_vm3, %v770_v58, %v772_v13 }
 0x689   : > { %v774_v60 = vpack.c.bf16 %v773_v59, %v773_v59 }
 0x68b   : > { %964 = vmatmul.msk.bf16.vlgmr.msrb.gmra.mxu0 %vm541_vm1, %v774_v60 }
 0x708   : > { %v807_v62 = vpop.f32.mrf.mxu0 }
 0x709   : > { %v808_v63 = vadd.f32 %v1057_v61, %v807_v62 }
 0x70b   : > { %vm811_vm4 = vweird.f32 %v808_v63 }
 0x70c   : > { %vm812_vm7 = vmxor %vm811_vm4, %vm1238_vm6 }
 0x70d   : > { %v813_v33 = vsel %vm812_vm7, 1.0, %v1239_v30 }
 0x70e   : > { %815 = vst.msk [vmem:[%s507_s29] sm:$0xff] %vm814_vm5, %v813_v33 }
 0x710   : > { %v809_v0 = vpop.f32.mrf.mxu0 }
 0x711 PF: > { %s1528_s17 = sld [smem:[#allocation12_spill]]  ;;  %p25_p3 = scmp.ge.s32.totalorder %s1364_s30, 4  }
 0x712   : > { %s1529_s25 = smov %s1222_s26  ;;  %s1530_s26 = smov %s1226_s27 }
 0x713   : > { %s1532_s28 = smov %s1364_s30  ;;  %27 = sbr.rel (!%p25_p3) target bundleno = 9 (0x9), region = 124 }
 0x717   : > { %s1531_s27 = smov %s1528_s17 }
 0x718   :  { %835 = vsyncpa [#allocation3], 1 }
 0x719   :  { %837 = vsyncpa [#allocation3 + $0x1], 1 }
 0x71a   :  { %838 = vsyncpa [#allocation5], 1 }
 0x71b   :  { %839 = vsyncpa [#allocation8], 1 }

</bundles_post_ra>
